<compile_context>
chip_gen: v6e
topology: v6e:2x2x1
jax: 0.10.0
libtpu: 0.0.40
codegen_flags: <defaults>
</compile_context>

<pallas_src>
import functools

import jax
import jax.numpy as jnp
from jax.experimental import pallas as pl
from jax.experimental.pallas import tpu as pltpu


def _patch_embed_kernel(x_ref, w_ref, b_ref, o_ref):
    # x_ref: (TM, K) bf16 patch rows
    # w_ref: (K, E)  bf16 projection weight (flattened conv kernel, transposed)
    # b_ref: (1, E)  f32 bias
    # o_ref: (TM, E) f32
    acc = jnp.dot(x_ref[...], w_ref[...], preferred_element_type=jnp.float32)
    o_ref[...] = (acc + b_ref[...]).astype(o_ref.dtype)


def _round_up(a, b):
    return (a + b - 1) // b * b


def _patch_matmul(patches, w, b, *, tm_max=512):
    """patches: (M, K), w: (K, E), b: (E,) -> (M, E) float32 via Pallas."""
    M, K = patches.shape
    E = w.shape[1]

    # Row tile: as large as possible (big DMAs, few grid steps), but no larger
    # than half the rows rounded to the bf16 sublane granule (16), so the grid
    # has >= 2 parallel steps whenever M > 16 and both v7x TensorCores work.
    granule = 16
    tm = max(granule, min(tm_max, _round_up(-(-M // 2), granule)))
    grid = pl.cdiv(M, tm)

    return pl.pallas_call(
        _patch_embed_kernel,
        out_shape=jax.ShapeDtypeStruct((M, E), jnp.float32),
        grid_spec=pltpu.PrefetchScalarGridSpec(
            num_scalar_prefetch=0,
            grid=(grid,),
            in_specs=[
                pl.BlockSpec((tm, K), lambda i: (i, 0)),
                # Weight / bias blocks are grid-invariant; Pallas skips the
                # re-DMA when the block index does not change.
                pl.BlockSpec((K, E), lambda i: (0, 0)),
                pl.BlockSpec((1, E), lambda i: (0, 0)),
            ],
            out_specs=pl.BlockSpec((tm, E), lambda i: (i, 0)),
        ),
        compiler_params=pltpu.CompilerParams(
            dimension_semantics=("parallel",)),
    )(patches, w, b.reshape(1, E).astype(jnp.float32))


def patch_embed_forward(x, weight, bias, patch_size,
                        compute_dtype=jnp.bfloat16):
    """Reproduces PatchEmbed.forward.

    x:      (B, C, H, W)  float32, NCHW like PyTorch.
    weight: (E, C, P, P)  Conv2d weight.
    bias:   (E,)          Conv2d bias.
    Returns (out, Hp, Wp) with out of shape (B, Hp*Wp, E), float32.
    """
    P = patch_size
    B, C, H, W = x.shape
    E = weight.shape[0]
    K = C * P * P

    # Pad right/bottom so H, W are multiples of P (same as F.pad in the module).
    pad_h = (-H) % P
    pad_w = (-W) % P
    if pad_h or pad_w:
        x = jnp.pad(x, ((0, 0), (0, 0), (0, pad_h), (0, pad_w)))
    Hp = (H + pad_h) // P
    Wp = (W + pad_w) // P

    # Unfold into patch rows, flattened in (c, ph, pw) order to match the
    # flattened OIHW conv weight.  The transpose + reshape + bf16 cast fuse
    # into a single XLA copy over x.
    # (B, C, Hp, P, Wp, P) -> (B, Hp, Wp, C, P, P) -> (B*Hp*Wp, C*P*P)
    patches = x.reshape(B, C, Hp, P, Wp, P)
    patches = jnp.transpose(patches, (0, 2, 4, 1, 3, 5))
    patches = patches.reshape(B * Hp * Wp, K).astype(compute_dtype)

    # Conv weight (E, C, P, P) -> (C*P*P, E), bf16.
    w_mat = weight.reshape(E, K).T.astype(compute_dtype)

    out = _patch_matmul(patches, w_mat, bias)          # (B*Hp*Wp, E) f32
    out = out.reshape(B, Hp * Wp, E)                    # flatten(2).transpose(1,2)
    # norm_layer=None -> nn.Identity(): nothing to do.
    return out, Hp, Wp


def _reference(x, weight, bias, patch_size):
    """Pure-JAX f32 reference (lax conv) for a sanity check."""
    P = patch_size
    B, C, H, W = x.shape
    pad_h = (-H) % P
    pad_w = (-W) % P
    if pad_h or pad_w:
        x = jnp.pad(x, ((0, 0), (0, 0), (0, pad_h), (0, pad_w)))
    y = jax.lax.conv_general_dilated(
        x, weight, window_strides=(P, P), padding="VALID",
        dimension_numbers=("NCHW", "OIHW", "NCHW"))
    y = y + bias.reshape(1, -1, 1, 1)
    B2, E, Hp, Wp = y.shape
    return y.reshape(B2, E, Hp * Wp).transpose(0, 2, 1), Hp, Wp


if __name__ == "__main__":
    # Small shapes consistent with the module: B=2, C=4, H=W=16, P=4, E=32.
    B, C, H, W = 2, 4, 16, 16
    P, E = 4, 32

    key = jax.random.PRNGKey(0)
    kx, kw, kb = jax.random.split(key, 3)
    x = jax.random.normal(kx, (B, C, H, W), dtype=jnp.float32)
    # Deterministic synthetic Conv2d params (shapes from nn.Conv2d(C, E, P, P)).
    weight = jax.random.normal(kw, (E, C, P, P), dtype=jnp.float32) * 0.02
    bias = jax.random.normal(kb, (E,), dtype=jnp.float32) * 0.02

    fwd = jax.jit(functools.partial(patch_embed_forward, patch_size=P))
    out, Hp, Wp = fwd(x, weight, bias)
    out = jax.block_until_ready(out)

    ref, Hr, Wr = _reference(x, weight, bias, P)
    assert out.shape == (B, Hp * Wp, E), out.shape
    assert (Hp, Wp) == (Hr, Wr)
    # bf16 inputs with f32 accumulation: allow bf16-rounding-level error.
    assert jnp.allclose(out, ref, atol=2e-2, rtol=2e-2), "mismatch vs reference"

    print("KERNEL_OK")
</pallas_src>

<mosaic_0001>
module attributes {stable_mosaic.version = 11 : i64} {
  func.func @_patch_embed_kernel(%arg0: i32, %arg1: memref<16x64xbf16, #tpu.memory_space<vmem>>, %arg2: memref<64x32xbf16, #tpu.memory_space<vmem>>, %arg3: memref<1x32xf32, #tpu.memory_space<vmem>>, %arg4: memref<16x32xf32, #tpu.memory_space<vmem>>) attributes {dimension_semantics = [#tpu.dimension_semantics<parallel>], iteration_bounds = array<i64: 2>, scalar_prefetch = 0 : i64, scratch_operands = 0 : i64, tpu.core_type = #tpu.core_type<tc>, window_params = [{transform_indices = @transform_0, window_bounds = array<i64: 16, 64>}, {pipeline_mode = #tpu.pipeline_mode<synchronous>, transform_indices = @transform_1, window_bounds = array<i64: 64, 32>}, {pipeline_mode = #tpu.pipeline_mode<synchronous>, transform_indices = @transform_2, window_bounds = array<i64: 1, 32>}, {transform_indices = @transform_3, window_bounds = array<i64: 16, 32>}]} {
    %c0 = arith.constant 0 : index
    %c0_0 = arith.constant 0 : index
    %0 = vector.load %arg1[%c0, %c0_0] : memref<16x64xbf16, #tpu.memory_space<vmem>>, vector<16x64xbf16>
    %c0_1 = arith.constant 0 : index
    %c0_2 = arith.constant 0 : index
    %1 = vector.load %arg2[%c0_1, %c0_2] : memref<64x32xbf16, #tpu.memory_space<vmem>>, vector<64x32xbf16>
    %cst = arith.constant dense<0.000000e+00> : vector<16x32xf32>
    %2 = tpu.matmul %0, %1, %cst {dimension_numbers = #tpu.dot_dimension_numbers<[1], [0], [0], [1], [0, 0, 1, 1], [], []>} : vector<16x64xbf16>, vector<64x32xbf16>, vector<16x32xf32> -> vector<16x32xf32>
    %c0_3 = arith.constant 0 : index
    %c0_4 = arith.constant 0 : index
    %3 = vector.load %arg3[%c0_3, %c0_4] : memref<1x32xf32, #tpu.memory_space<vmem>>, vector<1x32xf32>
    %4 = vector.broadcast %3 : vector<1x32xf32> to vector<16x32xf32>
    %5 = arith.addf %2, %4 : vector<16x32xf32>
    %c0_5 = arith.constant 0 : index
    %c0_6 = arith.constant 0 : index
    %6 = vector.load %arg4[%c0_5, %c0_6] : memref<16x32xf32, #tpu.memory_space<vmem>>, vector<16x32xf32>
    tpu.vector_store %arg4[%c0_5, %c0_6], %5 {strides = array<i32>} : memref<16x32xf32, #tpu.memory_space<vmem>>, vector<16x32xf32>,
    return
  }
  func.func @transform_0(%arg0: i32) -> (i32, i32) {
    %c0_i32 = arith.constant 0 : i32
    %c0_i32_0 = arith.constant 0 : i32
    return %arg0, %c0_i32 : i32, i32
  }
  func.func @transform_1(%arg0: i32) -> (i32, i32) {
    %c0_i32 = arith.constant 0 : i32
    %c0_i32_0 = arith.constant 0 : i32
    %c0_i32_1 = arith.constant 0 : i32
    return %c0_i32, %c0_i32_0 : i32, i32
  }
  func.func @transform_2(%arg0: i32) -> (i32, i32) {
    %c0_i32 = arith.constant 0 : i32
    %c0_i32_0 = arith.constant 0 : i32
    %c0_i32_1 = arith.constant 0 : i32
    return %c0_i32, %c0_i32_0 : i32, i32
  }
  func.func @transform_3(%arg0: i32) -> (i32, i32) {
    %c0_i32 = arith.constant 0 : i32
    %c0_i32_0 = arith.constant 0 : i32
    return %arg0, %c0_i32 : i32, i32
  }
}

</mosaic_0001>

<bundles_post_ra>
// kernel: patch_embed_forward.1
= control target key start
LH: loop header
LB: loop body
LE: loop exit
PB: predicated region body
PF: predicated region fallthrough
CT: control target
= control target key end

     0   :  { %8 = vsyncpa [#allocation3], 0  ;;  %s631_s0 = inlined_call_operand.vmem [shape: bf16[32,64], index: 0, kind: input, shape index: {}]   ;;  %s632_s1 = inlined_call_operand.vmem [shape: bf16[64,32], index: 1, kind: input, shape index: {}]   ;;  %s633_s2 = inlined_call_operand.vmem [shape: f32[1,32], index: 2, kind: input, shape index: {}]   ;;  %s634_s3 = inlined_call_operand.hbm [shape: f32[32,32], index: 3, kind: output, shape index: {}]  }
   0x1   :  { %10 = vsyncpa [#allocation3 + $0x1], 0  ;;  %s515_s12 = smov 0   ;;  %s517_s13 = smov 0  }
   0x2   :  { %s519_s14 = smov 0   ;;  %s521_s15 = smov 0  }
   0x3 LB: > { %s536_s16 = sadd.s32 4294967295, %s488_s15   ;;  %s343_s17 = sadd.s32 4294967294, %s488_s15   ;;  %s488_s15 = sphi %s521_s15, %s640_s15   ;;  %s484_s14 = sphi %s519_s14, %s639_s14   ;;  %s480_s13 = sphi %s517_s13, %s638_s13   ;;  %s476_s12 = sphi %s515_s12, %s637_s12  }
   0x4   : > { %s540_s18 = sadd.s32 1, %s488_s15   ;;  %s91_s19 = sadd.s32 1, %s484_s14 }
   0x5   : > { %s88_s20 = ssub.s32 %s488_s15, %s540_s18  ;;  %p101_p0 = scmp.ne.s32.totalorder %s484_s14, %s480_s13 }
   0x6   : > { %p89_p1 = scmp.eq.s32.totalorder %s88_s20, 0  ;;  %p102_p2 = scmp.eq.s32.totalorder %s536_s16, 1 }
   0x7   : > { %p107_p3 = scmp.ne.s32.totalorder %s480_s13, %s476_s12  ;;  %p108_p4 = scmp.eq.s32.totalorder %s343_s17, 1 }
   0x8   : > { %s551_s21 = scalar_select %p89_p1, %s484_s14, %s91_s19  }
   0x9   : > { %p553_p5 = por %p102_p2, %p101_p0  ;;  %p557_p6 = por %p108_p4, %p107_p3 }
   0xa   : > { %p346_p7 = scmp.ge.s32.totalorder %s488_s15, 1  ;;  %p141_p8 = scmp.lt.s32.totalorder %s488_s15, 3 }
   0xc   : > { %p142_p9 = pnand %p346_p7, %p141_p8 }
   0xd   : > { %s348_s28 = sshll.u32 (!%p142_p9), %s536_s16, 1  ;;  %s162_s10 = sand.u32 (!%p142_p9), 1, %s480_s13  }
   0xe   : > { %145 = sbr.rel (%p142_p9) target bundleno = 249 (0xf9), region = 32  ;;  %p166_p10 = scmp.lt.s32.totalorder (!%p142_p9), %s348_s28, 3 }
   0xf   : > { %s347_s11 = sshll.u32 (!%p142_p9), %s162_s10, 4  ;;  %s362_s25 = sshll.u32 (!%p142_p9), %s536_s16, 8 }
  0x10   : > { %s164_s20 = scalar_lea.vmem (!%p142_p9), [#allocation2], %s347_s11  ;;  %s591_s29 = scalar_lea.sflag (!%p142_p9), [#allocation3], %s162_s10 }
  0x11   : > { %s281_s24 = sshll.u32 (!%p142_p9), %s164_s20, 4  ;;  %s492_s16 = smov (!%p142_p9), [#allocation2]   ;;  %s584_s24 = int_to_ptr.vmem [resolvable:$true] %s281_s24 }
  0x12   : > { %s428_s30 = scalar_lea.vmem (!%p142_p9), %s584_s24, 256 }
  0x13   : > { %v423_v0 = vld [vmem:[%s632_s1 + $0x18] sm:$0xff]   ;;  %v490_v1 = vmov 0.0   ;;  %v424_v2 = vld [vmem:[%s632_s1 + $0x10] sm:$0xff]   ;;  %vm491_vm0 = vmmov 0   ;;  %s642_s28 = smov (!%p166_p10, %s348_s28), 3  ;;  %v425_v3 = vld [vmem:[%s632_s1 + $0x8] sm:$0xff]   ;;  %p429_p11 = scmp.ne.s32.totalorder %s584_s24, %s428_s30 }
  0x14   : > { %368 = vmatprep.subr.bf16.mxu0 %v490_v1  ;;  %376 = vmatprep.mubr.msk.bf16.mxu0 %vm491_vm0, %v490_v1  ;;  %s349_s4 = sshll.u32 %s642_s28, 2  ;;  %v426_v4 = vld [vmem:[%s632_s1] sm:$0xff]   ;;  %vm219_vm1 = vcmask 523264   ;;  %vm264_vm2 = vcmask 261120   ;;  %s589_s28 = scalar_lea.hbm %s634_s3, %s362_s25 }
  0x15   : > { %369 = vmatpush3.bf16.msra.mxu0 %v423_v0  ;;  %s169_s7 = scalar_lea.vmem %s631_s0, %s349_s4  ;;  %v350_v6 = vld [vmem:[%s633_s2] ss:$0 sm:$0xff]  ;;  %p430_p12 = pnand %p429_p11, %p553_p5 }
  0x16   : > { %370 = vmatprep.subr.bf16.mxu0 %v490_v1  ;;  %v427_v5 = vld [vmem:[%s169_s7] sm:$0xff]   ;;  %s432_s4 = sshll.u32 %s492_s16, 4  ;;  %s433_s4 = int_to_ptr.vmem [resolvable:$false] %s432_s4 }
  0x17   : > { %p431_p13 = pneg %p430_p12  ;;  %s434_s5 = scalar_lea.vmem %s433_s4, 512 }
  0x18   : > { %p435_p0 = scmp.lt.s32.totalorder %s584_s24, %s433_s4  ;;  %p436_p1 = scmp.lt.s32.totalorder %s434_s5, %s428_s30 }
  0x19   : > { %371 = vmatpush3.bf16.msra.mxu0 %v424_v2 }
  0x1a   : > { %372 = vmatprep.subr.bf16.mxu0 %v490_v1  ;;  %p437_p2 = por %p436_p1, %p435_p0 }
  0x1c   : > { %p438_p3 = pnand %p437_p2, %p431_p13 }
  0x1d   : > { %373 = vmatpush3.bf16.msra.mxu0 %v425_v3 }
  0x1e   : > { %374 = vmatprep.subr.bf16.mxu0 %v490_v1 }
  0x21   : > { %375 = vmatpush3.bf16.msra.mxu0 %v426_v4 }
  0x24   : > { %377 = vmatmul.mubr.msk.bf16.vlgmr.msra.gmra.mxu0 %vm219_vm1, %v427_v5 }
  0xe4   : > { %v257_v7 = vpop.f32.mrf.mxu0 }
  0xe5   : > { %v258_v8 = vadd.f32 %v350_v6, %v257_v7 }
  0xe6   : > { %v378_v9 = vpop.f32.mrf.mxu0 }
  0xe7   : > { %265 = vst.msk [vmem:[%s164_s20] sm:$0xff] %vm264_vm2, %v258_v8 }
  0xe8   : > { %v260_v10 = vpop.f32.mrf.mxu0 }
  0xe9   : > { %v261_v11 = vadd.f32 %v350_v6, %v260_v10 }
  0xea   : > { %v379_v12 = vpop.f32.mrf.mxu0 }
  0xeb   : > { %266 = vst.msk [vmem:[%s164_s20 + $0x8] sm:$0xff] %vm264_vm2, %v261_v11 }
  0xec   : > { %441 = shalt.err (!%p438_p3)
}
  0xed   : > { %s442_s6 = scalar_lea.hbm %s589_s28, 256  ;;  %s446_s9 = scalar_lea.hbm %s634_s3, 512 }
  0xee   : > { %p443_p4 = scmp.ne.s32.totalorder %s589_s28, %s442_s6  ;;  %p447_p9 = scmp.lt.s32.totalorder %s589_s28, %s634_s3 }
  0xef   : > { %p448_p10 = scmp.lt.s32.totalorder %s446_s9, %s442_s6 }
  0xf0   : > { %p444_p7 = pnand %p443_p4, %p553_p5 }
  0xf1   : > { %p449_p11 = por %p448_p10, %p447_p9 }
  0xf2   : > { %p445_p8 = pneg %p444_p7 }
  0xf4   : > { %p450_p12 = pnand %p449_p11, %p445_p8 }
  0xf6   : > { %453 = shalt.err (!%p450_p12)
}
  0xf7   : > { %s493_s17 = smov 128   ;;  %s494_s19 = smov 8  }
  0xf8   : > { %380 = dma.vmem_to_hbm [thread:$0]  (%p553_p5), %s584_s24, 256, %s589_s28, %s591_s29, %s493_s17, %s493_s17, %s494_s19  }
  0xf9 PF: > { %p386_p13 = scmp.ge.s32.totalorder %s488_s15, 2  ;;  %s296_s20 = sand.u32 1, %s476_s12  }
  0xfa   : > { %s297_s25 = scalar_lea.sflag [#allocation3], %s296_s20 }
  0xfb   : > { %p383_p0 = pnand %p386_p13, %p557_p6 }
  0xfd   : > { %p384_p1 = pneg %p383_p0 }
  0xff   : > { %471 = dma.done.wait (%p384_p1), %s297_s25, 256  }
 0x100   : > { %473 = vsyncadd (%p384_p1), %s297_s25, 4294967040  ;;  %p13_p2 = scmp.ge.s32.totalorder %s540_s18, 4   ;;  %s637_s12 = smov %s480_s13 }
 0x101   : > { %s638_s13 = smov %s484_s14  ;;  %s639_s14 = smov %s551_s21 }
 0x102   : > { %s640_s15 = smov %s540_s18  ;;  %15 = sbr.rel (!%p13_p2) target bundleno = 3 (0x3), region = 67 }
 0x107   :  { %302 = vsyncpa [#allocation3], 1 }
 0x108   :  { %304 = vsyncpa [#allocation3 + $0x1], 1 }

</bundles_post_ra>
